<compile_context>
chip_gen: v6e
topology: v6e:2x2x1
jax: 0.10.0
libtpu: 0.0.40
codegen_flags: <defaults>
</compile_context>

<pallas_src>
import jax
import jax.numpy as jnp
from jax.experimental import pallas as pl
from jax.experimental.pallas import tpu as pltpu


def _round_up(x, m):
    return ((x + m - 1) // m) * m


def _pick_tile(dim, max_tile, align):
    """Pick a tile (multiple of `align`, <= max_tile) for `dim`.

    Prefers the tile that minimizes the padded extent round_up(dim, tile);
    among ties, the largest tile.  Returns (tile, padded_dim).
    """
    d = _round_up(max(dim, 1), align)
    if d <= max_tile:
        return d, d
    max_tile = max(align, (max_tile // align) * align)
    best_t, best_pad = None, None
    t = max_tile
    while t >= align:
        pad = _round_up(d, t)
        if best_pad is None or pad < best_pad:
            best_t, best_pad = t, pad
        t -= align
    return best_t, best_pad


def _fc_relu_kernel_acc(x_ref, w_ref, b_ref, o_ref, acc_ref):
    # x:(tm,tk) w:(tk,tn) b:(1,tn) f32  o:(tm,tn)  acc:(tm,tn) f32 scratch.
    k = pl.program_id(2)
    prod = jnp.dot(x_ref[...], w_ref[...], preferred_element_type=jnp.float32)

    @pl.when(k == 0)
    def _():
        acc_ref[...] = prod          # direct store: no zero-init + RMW pass

    @pl.when(k > 0)
    def _():
        acc_ref[...] += prod

    @pl.when(k == pl.num_programs(2) - 1)
    def _():
        y = acc_ref[...] + b_ref[...]            # bias broadcast over rows
        o_ref[...] = jnp.maximum(y, 0.0).astype(o_ref.dtype)


def _fc_relu_kernel_f32out(x_ref, w_ref, b_ref, o_ref):
    # f32 output: accumulate directly into o_ref (resident across the K axis),
    # no VMEM scratch and no final copy.
    k = pl.program_id(2)
    prod = jnp.dot(x_ref[...], w_ref[...], preferred_element_type=jnp.float32)

    @pl.when(k == 0)
    def _():
        o_ref[...] = prod

    @pl.when(k > 0)
    def _():
        o_ref[...] += prod

    @pl.when(k == pl.num_programs(2) - 1)
    def _():
        o_ref[...] = jnp.maximum(o_ref[...] + b_ref[...], 0.0)


def make_fc_layer(w, b, *, compute_dtype=jnp.bfloat16, out_dtype=None,
                  tm=512, tn=1024, tk=1024, vmem_limit_bytes=None):
    """Build ReLU(x @ W.T + b) (PyTorch nn.Linear + ReLU) as a Pallas call.

    w: (out_features, in_features) in PyTorch layout, b: (out_features,).
    The transpose / pad / cast of W and b happens ONCE here, not per call.

    Per-generation tile guidance (pass via tm/tn/tk):
      v7x: tm=512,  tn=1024, tk=1024   (default; ~12 MiB VMEM, both TCs used)
      v6e: tm=1024, tn=2048, tk=1024   with vmem_limit_bytes ~ 96<<20
      v5e: tm=512,  tn=512,  tk=1024
    """
    N, K = w.shape
    assert b.shape == (N,)
    if compute_dtype is None:
        compute_dtype = jnp.asarray(w).dtype

    tn, Np = _pick_tile(N, tn, 128)
    tk, Kp = _pick_tile(K, tk, 128)

    # Hoisted parameter prep: transpose to (K, N), cast, pad. Done once.
    w_t = jnp.asarray(w).T.astype(compute_dtype)
    wp = w_t if (Kp, Np) == (K, N) else jnp.pad(w_t, ((0, Kp - K), (0, Np - N)))
    bp = jnp.asarray(b).astype(jnp.float32)
    bp = (bp if Np == N else jnp.pad(bp, (0, Np - N))).reshape(1, Np)

    # Sublane alignment for the batch tile: sub-32-bit dtypes pack rows.
    in_itemsize = jnp.dtype(compute_dtype).itemsize
    m_align = {4: 8, 2: 16, 1: 32}.get(in_itemsize, 8)

    def apply(x):
        odtype = out_dtype if out_dtype is not None else x.dtype
        lead = x.shape[:-1]
        assert x.shape[-1] == K
        x2 = x.reshape(-1, K).astype(compute_dtype)
        M = x2.shape[0]

        tm_l, Mp = _pick_tile(M, tm, m_align)
        xp = x2 if (Mp, Kp) == (M, K) else jnp.pad(x2, ((0, Mp - M), (0, Kp - K)))

        # Megacore (v7x): make sure a 'parallel' axis has >= 2 blocks.
        tn_l = tn
        if Mp // tm_l == 1 and Np // tn_l == 1 and Np % 256 == 0:
            tn_l = Np // 2

        grid = (Mp // tm_l, Np // tn_l, Kp // tk)

        out_itemsize = jnp.dtype(odtype).itemsize
        cost = pl.CostEstimate(
            flops=2 * Mp * Kp * Np,
            transcendentals=0,
            # x re-read per N block, W re-read per M block, out written once.
            bytes_accessed=(Mp * Kp * grid[1] + Kp * Np * grid[0]) * in_itemsize
            + Mp * Np * out_itemsize,
        )

        f32_out = jnp.dtype(odtype) == jnp.dtype(jnp.float32)
        kernel = _fc_relu_kernel_f32out if f32_out else _fc_relu_kernel_acc
        scratch = [] if f32_out else [pltpu.VMEM((tm_l, tn_l), jnp.float32)]

        out = pl.pallas_call(
            kernel,
            out_shape=jax.ShapeDtypeStruct((Mp, Np), odtype),
            grid_spec=pltpu.PrefetchScalarGridSpec(
                num_scalar_prefetch=0,
                grid=grid,
                in_specs=[
                    pl.BlockSpec((tm_l, tk), lambda i, j, k: (i, k)),  # x tile
                    pl.BlockSpec((tk, tn_l), lambda i, j, k: (k, j)),  # W tile
                    pl.BlockSpec((1, tn_l), lambda i, j, k: (0, j)),   # bias row
                ],
                out_specs=pl.BlockSpec((tm_l, tn_l), lambda i, j, k: (i, j)),
                scratch_shapes=scratch,
            ),
            compiler_params=pltpu.CompilerParams(
                dimension_semantics=("parallel", "parallel", "arbitrary"),
                vmem_limit_bytes=vmem_limit_bytes),
            cost_estimate=cost,
        )(xp, wp, bp)

        return out[:M, :N].reshape(*lead, N)

    return apply


def fc_layer(x, w, b, **kwargs):
    """One-shot convenience wrapper: ReLU(x @ w.T + b)."""
    return make_fc_layer(w, b, **kwargs)(x)


if __name__ == "__main__":
    # Small shapes consistent with FCLayer(in_features=32, out_features=64).
    batch, in_features, out_features = 16, 32, 64

    key = jax.random.PRNGKey(0)
    kx, kw, kb = jax.random.split(key, 3)

    # nn.Linear-style uniform(-1/sqrt(K), 1/sqrt(K)) init, PyTorch layout.
    bound = 1.0 / jnp.sqrt(jnp.float32(in_features))
    w = jax.random.uniform(kw, (out_features, in_features), jnp.float32,
                           minval=-bound, maxval=bound)
    b = jax.random.uniform(kb, (out_features,), jnp.float32,
                           minval=-bound, maxval=bound)
    x = jax.random.normal(kx, (batch, in_features), jnp.float32)

    ref = jnp.maximum(x @ w.T + b, 0.0)

    # 1) f32 compute path: exact vs. the PyTorch reference (no-scratch kernel).
    fc_f32 = make_fc_layer(w, b, compute_dtype=jnp.float32)
    out_f32 = jax.block_until_ready(fc_f32(x))
    assert out_f32.shape == (batch, out_features)
    assert jnp.allclose(out_f32, ref, atol=1e-5, rtol=1e-5)

    # 2) Default bf16-compute path (f32 accumulation) — production config.
    fc_bf16 = make_fc_layer(w, b)
    out_bf16 = jax.block_until_ready(fc_bf16(x))
    assert out_bf16.shape == (batch, out_features)
    assert jnp.allclose(out_bf16, ref, atol=5e-2, rtol=5e-2)

    # 3) bf16 output path — exercises the f32-scratch accumulator kernel.
    fc_bf16_out = make_fc_layer(w, b, out_dtype=jnp.bfloat16)
    out_b = jax.block_until_ready(fc_bf16_out(x))
    assert jnp.allclose(out_b.astype(jnp.float32), ref, atol=7e-2, rtol=7e-2)

    print("KERNEL_OK")
</pallas_src>

<mosaic_0001>
module attributes {stable_mosaic.version = 11 : i64} {
  func.func @_fc_relu_kernel_f32out(%arg0: i32, %arg1: i32, %arg2: i32, %arg3: memref<16x128xf32, #tpu.memory_space<vmem>>, %arg4: memref<128x128xf32, #tpu.memory_space<vmem>>, %arg5: memref<1x128xf32, #tpu.memory_space<vmem>>, %arg6: memref<16x128xf32, #tpu.memory_space<vmem>>) attributes {dimension_semantics = [#tpu.dimension_semantics<parallel>, #tpu.dimension_semantics<parallel>, #tpu.dimension_semantics<arbitrary>], iteration_bounds = array<i64: 1, 1, 1>, scalar_prefetch = 0 : i64, scratch_operands = 0 : i64, tpu.core_type = #tpu.core_type<tc>, window_params = [{transform_indices = @transform_0, window_bounds = array<i64: 16, 128>}, {transform_indices = @transform_1, window_bounds = array<i64: 128, 128>}, {transform_indices = @transform_2, window_bounds = array<i64: 1, 128>}, {transform_indices = @transform_3, window_bounds = array<i64: 16, 128>}]} {
    %c0 = arith.constant 0 : index
    %c0_0 = arith.constant 0 : index
    %0 = vector.load %arg3[%c0, %c0_0] : memref<16x128xf32, #tpu.memory_space<vmem>>, vector<16x128xf32>
    %c0_1 = arith.constant 0 : index
    %c0_2 = arith.constant 0 : index
    %1 = vector.load %arg4[%c0_1, %c0_2] : memref<128x128xf32, #tpu.memory_space<vmem>>, vector<128x128xf32>
    %cst = arith.constant dense<0.000000e+00> : vector<16x128xf32>
    %2 = tpu.matmul %0, %1, %cst {dimension_numbers = #tpu.dot_dimension_numbers<[1], [0], [0], [1], [0, 0, 1, 1], [], []>} : vector<16x128xf32>, vector<128x128xf32>, vector<16x128xf32> -> vector<16x128xf32>
    %c0_i32 = arith.constant 0 : i32
    %3 = arith.cmpi eq, %arg2, %c0_i32 : i32
    %4 = arith.extui %3 : i1 to i32
    %c0_i32_3 = arith.constant 0 : i32
    %5 = arith.cmpi ne, %4, %c0_i32_3 : i32
    scf.if %5 {
      %c0_8 = arith.constant 0 : index
      %c0_9 = arith.constant 0 : index
      %12 = vector.load %arg6[%c0_8, %c0_9] : memref<16x128xf32, #tpu.memory_space<vmem>>, vector<16x128xf32>
      tpu.vector_store %arg6[%c0_8, %c0_9], %2 {strides = array<i32>} : memref<16x128xf32, #tpu.memory_space<vmem>>, vector<16x128xf32>,
    } else {
    }
    %c0_i32_4 = arith.constant 0 : i32
    %6 = arith.cmpi sgt, %arg2, %c0_i32_4 : i32
    %7 = arith.extui %6 : i1 to i32
    %c0_i32_5 = arith.constant 0 : i32
    %8 = arith.cmpi ne, %7, %c0_i32_5 : i32
    scf.if %8 {
      %c0_8 = arith.constant 0 : index
      %c0_9 = arith.constant 0 : index
      %12 = vector.load %arg6[%c0_8, %c0_9] : memref<16x128xf32, #tpu.memory_space<vmem>>, vector<16x128xf32>
      %13 = arith.addf %12, %2 : vector<16x128xf32>
      %c0_10 = arith.constant 0 : index
      %c0_11 = arith.constant 0 : index
      %14 = vector.load %arg6[%c0_10, %c0_11] : memref<16x128xf32, #tpu.memory_space<vmem>>, vector<16x128xf32>
      tpu.vector_store %arg6[%c0_10, %c0_11], %13 {strides = array<i32>} : memref<16x128xf32, #tpu.memory_space<vmem>>, vector<16x128xf32>,
    } else {
    }
    %c0_i32_6 = arith.constant 0 : i32
    %9 = arith.cmpi eq, %arg2, %c0_i32_6 : i32
    %10 = arith.extui %9 : i1 to i32
    %c0_i32_7 = arith.constant 0 : i32
    %11 = arith.cmpi ne, %10, %c0_i32_7 : i32
    scf.if %11 {
      %c0_8 = arith.constant 0 : index
      %c0_9 = arith.constant 0 : index
      %12 = vector.load %arg6[%c0_8, %c0_9] : memref<16x128xf32, #tpu.memory_space<vmem>>, vector<16x128xf32>
      %c0_10 = arith.constant 0 : index
      %c0_11 = arith.constant 0 : index
      %13 = vector.load %arg5[%c0_10, %c0_11] : memref<1x128xf32, #tpu.memory_space<vmem>>, vector<1x128xf32>
      %14 = vector.broadcast %13 : vector<1x128xf32> to vector<16x128xf32>
      %15 = arith.addf %12, %14 : vector<16x128xf32>
      %cst_12 = arith.constant 0.000000e+00 : f32
      %16 = vector.broadcast %cst_12 : f32 to vector<16x128xf32>
      %17 = arith.maximumf %15, %16 : vector<16x128xf32>
      %c0_13 = arith.constant 0 : index
      %c0_14 = arith.constant 0 : index
      %18 = vector.load %arg6[%c0_13, %c0_14] : memref<16x128xf32, #tpu.memory_space<vmem>>, vector<16x128xf32>
      tpu.vector_store %arg6[%c0_13, %c0_14], %17 {strides = array<i32>} : memref<16x128xf32, #tpu.memory_space<vmem>>, vector<16x128xf32>,
    } else {
    }
    return
  }
  func.func @transform_0(%arg0: i32, %arg1: i32, %arg2: i32) -> (i32, i32) {
    %c0_i32 = arith.constant 0 : i32
    return %arg0, %arg2 : i32, i32
  }
  func.func @transform_1(%arg0: i32, %arg1: i32, %arg2: i32) -> (i32, i32) {
    %c0_i32 = arith.constant 0 : i32
    return %arg2, %arg1 : i32, i32
  }
  func.func @transform_2(%arg0: i32, %arg1: i32, %arg2: i32) -> (i32, i32) {
    %c0_i32 = arith.constant 0 : i32
    %c0_i32_0 = arith.constant 0 : i32
    return %c0_i32, %arg1 : i32, i32
  }
  func.func @transform_3(%arg0: i32, %arg1: i32, %arg2: i32) -> (i32, i32) {
    %c0_i32 = arith.constant 0 : i32
    return %arg0, %arg1 : i32, i32
  }
}

</mosaic_0001>

<bundles_post_ra>
// kernel: tpu_custom_call.1
= control target key start
LH: loop header
LB: loop body
LE: loop exit
PB: predicated region body
PF: predicated region fallthrough
CT: control target
= control target key end

     0   :  { %8 = vsyncpa [#allocation3], 0  ;;  %s359_s0 = inlined_call_operand.hbm [shape: f32[16,128], index: 0, kind: input, shape index: {}]   ;;  %s360_s1 = inlined_call_operand.hbm [shape: f32[128,128], index: 1, kind: input, shape index: {}]   ;;  %s361_s2 = inlined_call_operand.vmem [shape: f32[1,128], index: 2, kind: input, shape index: {}]   ;;  %s362_s3 = inlined_call_operand.hbm [shape: f32[16,128], index: 3, kind: output, shape index: {}]  }
   0x1   :  { %9 = vsyncpa [#allocation6], 0 }
   0x2   :  { %10 = vsyncpa [#allocation4], 0  ;;  %s313_s12 = smov [#allocation2]  }
   0x3   :  { %s16_s13 = sshll.u32 %s313_s12, 4  ;;  %s17_s13 = int_to_ptr.vmem [resolvable:$true] %s16_s13 }
   0x4   :  { %s255_s14 = scalar_lea.vmem %s17_s13, 256  ;;  %p260_p1 = scmp.lt.s32.totalorder %s17_s13, %s17_s13 }
   0x5   :  { %p256_p0 = scmp.ne.s32.totalorder %s17_s13, %s255_s14  ;;  %p261_p2 = scmp.lt.s32.totalorder %s255_s14, %s255_s14 }
   0x7   :  { %p262_p3 = por %p261_p2, %p260_p1 }
   0x9   :  { %p263_p4 = pnand %p262_p3, %p256_p0 }
   0xb   :  { %266 = shalt.err (!%p263_p4)
}
   0xc   :  { %s314_s15 = smov 128   ;;  %s315_s16 = smov 8  }
   0xd   :  { %22 = dma.hbm_to_vmem [thread:$0]  %s359_s0, 256, %s17_s13, [#allocation3], %s314_s15, %s314_s15, %s315_s16  }
   0xe   :  { %s316_s19 = smov [#allocation5]  }
   0xf   :  { %s28_s20 = sshll.u32 %s316_s19, 4  ;;  %s29_s20 = int_to_ptr.vmem [resolvable:$true] %s28_s20 }
  0x10   :  { %s275_s21 = scalar_lea.vmem %s29_s20, 2048  ;;  %p280_p6 = scmp.lt.s32.totalorder %s29_s20, %s29_s20 }
  0x11   :  { %p276_p5 = scmp.ne.s32.totalorder %s29_s20, %s275_s21  ;;  %p281_p7 = scmp.lt.s32.totalorder %s275_s21, %s275_s21 }
  0x13   :  { %p282_p8 = por %p281_p7, %p280_p6 }
  0x15   :  { %p283_p9 = pnand %p282_p8, %p276_p5 }
  0x17   :  { %286 = shalt.err (!%p283_p9)
}
  0x18   :  { %34 = dma.hbm_to_vmem [thread:$0]  %s360_s1, 2048, %s29_s20, [#allocation6], %s314_s15, %s314_s15, %s315_s16  }
  0x19   :  { %307 = dma.done.wait [#allocation3], 256  }
  0x1a   :  { %308 = vsyncadd [#allocation3], 4294967040 }
  0x1b   :  { %309 = dma.done.wait [#allocation6], 2048  }
  0x1c   :  { %310 = vsyncadd [#allocation6], 4294965248  ;;  %v60_v0 = vld [vmem:[#allocation5 + $0x78] sm:$0xff]  ;;  %v59_v1 = vld [vmem:[#allocation5 + $0x70] sm:$0xff]  ;;  %s317_s24 = smov [#allocation7]  }
  0x1d   :  { %207 = vmatprep.subr.mxu0 %v60_v0  ;;  %v58_v2 = vld [vmem:[#allocation5 + $0x68] sm:$0xff]  ;;  %v57_v3 = vld [vmem:[#allocation5 + $0x60] sm:$0xff]  ;;  %v43_v4 = vld [vmem:[#allocation2] sm:$0xff]  ;;  %s175_s25 = sshll.u32 %s317_s24, 4  ;;  %s176_s25 = int_to_ptr.vmem [resolvable:$true] %s175_s25 }
  0x1e   :  { %208 = vmatpush3.msra.mxu0 %v60_v0  ;;  %v56_v5 = vld [vmem:[#allocation5 + $0x58] sm:$0xff]  ;;  %239 = vmatprep.mubr.f32.mxu0 %v43_v4  ;;  %v55_v6 = vld [vmem:[#allocation5 + $0x50] sm:$0xff]  ;;  %v54_v7 = vld [vmem:[#allocation5 + $0x48] sm:$0xff]  ;;  %s287_s26 = scalar_lea.vmem %s176_s25, 256  ;;  %p292_p11 = scmp.lt.s32.totalorder %s176_s25, %s176_s25 }
  0x1f   :  { %209 = vmatprep.subr.mxu0 %v59_v1  ;;  %v53_v8 = vld [vmem:[#allocation5 + $0x40] sm:$0xff]  ;;  %v52_v9 = vld [vmem:[#allocation5 + $0x38] sm:$0xff]  ;;  %v51_v10 = vld [vmem:[#allocation5 + $0x30] sm:$0xff]  ;;  %p288_p10 = scmp.ne.s32.totalorder %s176_s25, %s287_s26  ;;  %p293_p12 = scmp.lt.s32.totalorder %s287_s26, %s287_s26 }
  0x20   :  { %210 = vmatpush3.msra.mxu0 %v59_v1  ;;  %v50_v11 = vld [vmem:[#allocation5 + $0x28] sm:$0xff]  ;;  %v49_v12 = vld [vmem:[#allocation5 + $0x20] sm:$0xff]  ;;  %v48_v13 = vld [vmem:[#allocation5 + $0x18] sm:$0xff] }
  0x21   :  { %211 = vmatprep.subr.mxu0 %v58_v2  ;;  %v47_v14 = vld [vmem:[#allocation5 + $0x10] sm:$0xff]  ;;  %v46_v15 = vld [vmem:[#allocation5 + $0x8] sm:$0xff]  ;;  %v45_v16 = vld [vmem:[#allocation5] sm:$0xff]  ;;  %p294_p13 = por %p293_p12, %p292_p11 }
  0x22   :  { %212 = vmatpush3.msra.mxu0 %v58_v2  ;;  %v44_v17 = vld [vmem:[#allocation2 + $0x8] sm:$0xff]  ;;  %v188_v18 = vld [vmem:[%s361_s2] ss:$0 sm:$0xff] }
  0x23   :  { %213 = vmatprep.subr.mxu0 %v57_v3  ;;  %p295_p0 = pnand %p294_p13, %p288_p10 }
  0x24   :  { %214 = vmatpush3.msra.mxu0 %v57_v3 }
  0x25   :  { %215 = vmatprep.subr.mxu0 %v56_v5 }
  0x26   :  { %216 = vmatpush3.msra.mxu0 %v56_v5 }
  0x27   :  { %217 = vmatprep.subr.mxu0 %v55_v6 }
  0x28   :  { %218 = vmatpush3.msra.mxu0 %v55_v6 }
  0x29   :  { %219 = vmatprep.subr.mxu0 %v54_v7 }
  0x2a   :  { %220 = vmatpush3.msra.mxu0 %v54_v7 }
  0x2b   :  { %221 = vmatprep.subr.mxu0 %v53_v8 }
  0x2c   :  { %222 = vmatpush3.msra.mxu0 %v53_v8 }
  0x2d   :  { %223 = vmatprep.subr.mxu0 %v52_v9 }
  0x2e   :  { %224 = vmatpush3.msra.mxu0 %v52_v9 }
  0x2f   :  { %225 = vmatprep.subr.mxu0 %v51_v10 }
  0x30   :  { %226 = vmatpush3.msra.mxu0 %v51_v10 }
  0x31   :  { %227 = vmatprep.subr.mxu0 %v50_v11 }
  0x32   :  { %228 = vmatpush3.msra.mxu0 %v50_v11 }
  0x33   :  { %229 = vmatprep.subr.mxu0 %v49_v12 }
  0x34   :  { %230 = vmatpush3.msra.mxu0 %v49_v12 }
  0x35   :  { %231 = vmatprep.subr.mxu0 %v48_v13 }
  0x36   :  { %232 = vmatpush3.msra.mxu0 %v48_v13 }
  0x37   :  { %233 = vmatprep.subr.mxu0 %v47_v14 }
  0x38   :  { %234 = vmatpush3.msra.mxu0 %v47_v14 }
  0x39   :  { %235 = vmatprep.subr.mxu0 %v46_v15 }
  0x3a   :  { %236 = vmatpush3.msra.mxu0 %v46_v15 }
  0x3b   :  { %237 = vmatprep.subr.mxu0 %v45_v16 }
  0x3c   :  { %238 = vmatpush3.msra.mxu0 %v45_v16 }
  0x3d   :  { %240 = vmatmul.mubr.f32.vlgmr.msra.gmra.mxu0 %v44_v17 }
  0xfd   :  { %v241_v19 = vpop.f32.mrf.mxu0 }
  0xfe   :  { %v165_v20 = vadd.f32 %v241_v19, %v188_v18 }
  0xff   :  { %v127_v21 = vpop.f32.mrf.mxu0 }
 0x100   :  { %v164_v22 = vadd.f32 %v188_v18, %v127_v21  ;;  %v167_v23 = vmax.f32 %v165_v20, 0.0 }
 0x102   :  { %v166_v24 = vmax.f32 %v164_v22, 0.0  ;;  %169 = vst [vmem:[#allocation7 + $0x8] sm:$0xff] %v167_v23 }
 0x104   :  { %168 = vst [vmem:[#allocation7] sm:$0xff] %v166_v24 }
 0x105   :  { %298 = shalt.err (!%p295_p0)
}
 0x106   :  { %181 = dma.vmem_to_hbm [thread:$0]  %s176_s25, 256, %s362_s3, [#allocation4], %s314_s15, %s314_s15, %s315_s16  }
 0x107   :  { %311 = dma.done.wait [#allocation4], 256  }
 0x108   :  { %312 = vsyncadd [#allocation4], 4294967040 }
 0x109   :  { %185 = vsyncpa [#allocation3], 1 }
 0x10a   :  { %186 = vsyncpa [#allocation6], 1 }
 0x10b   :  { %187 = vsyncpa [#allocation4], 1 }

</bundles_post_ra>
